<compile_context>
chip_gen: v6e
topology: v6e:2x2x1
jax: 0.10.0
libtpu: 0.0.40
codegen_flags: <defaults>
</compile_context>

<pallas_src>
import functools

import jax
import jax.numpy as jnp
from jax.experimental import pallas as pl
from jax.experimental.pallas import tpu as pltpu


_VMEM_LIMIT_BYTES = 32 * 1024 * 1024   # safe scoped-VMEM limit on v5e/v6e/v7x


# ---------------------------------------------------------------------------
# Kernel 1: lane-major VPU contraction (small channel counts).
#
#   a_ref : (TB, 2*Cin, M)      activations, [re | im] stacked on channel axis,
#                               modes on the lane axis (natural rfft layout)
#   w_ref : (2*Cin, 2*Cout, M)  stacked weight [[wr, wi], [-wi, wr]], resident
#   o_ref : (TB, 2*Cout, M)     [re | im] stacked on the channel axis
#
# out[b, o, m] = sum_i a[b, i, m] * w[i, o, m]  -- pure VPU multiply-adds with
# the mode axis on lanes; no MXU fill problem, no cross-lane traffic.
# ---------------------------------------------------------------------------
def _contract_vpu_kernel(a_ref, w_ref, o_ref):
    a = a_ref[...]
    w = w_ref[...]
    two_cin = a.shape[1]
    acc = a[:, 0:1, :] * w[0:1, :, :]
    for i in range(1, two_cin):                       # static unroll; small Cin
        acc = acc + a[:, i:i + 1, :] * w[i:i + 1, :, :]
    o_ref[...] = acc.astype(o_ref.dtype)


def contract_modes_vpu(a, w, *, block_batch=None):
    """a: (B, 2Cin, M) f32,  w: (2Cin, 2Cout, M) f32  ->  (B, 2Cout, M) f32."""
    B, ci2, M = a.shape
    _, co2, _ = w.shape

    if block_batch is None:
        per_row = 4 * M * (ci2 + 2 * co2)             # act + out + acc temps
        block_batch = max(1, min(B, (4 << 20) // max(per_row, 1)))
    grid = (pl.cdiv(B, block_batch),)

    flops = 2 * B * ci2 * co2 * M
    bytes_accessed = 4 * (B * ci2 * M + ci2 * co2 * M + B * co2 * M)

    return pl.pallas_call(
        _contract_vpu_kernel,
        out_shape=jax.ShapeDtypeStruct((B, co2, M), jnp.float32),
        grid=grid,
        in_specs=[
            pl.BlockSpec((block_batch, ci2, M), lambda b: (b, 0, 0)),
            # full weight resident in VMEM: constant index_map -> single DMA
            pl.BlockSpec((ci2, co2, M), lambda b: (0, 0, 0)),
        ],
        out_specs=pl.BlockSpec((block_batch, co2, M), lambda b: (b, 0, 0)),
        compiler_params=pltpu.CompilerParams(
            dimension_semantics=("parallel",),
            vmem_limit_bytes=_VMEM_LIMIT_BYTES,
        ),
        cost_estimate=pl.CostEstimate(
            flops=flops, transcendentals=0, bytes_accessed=bytes_accessed),
    )(a, w)


# ---------------------------------------------------------------------------
# Kernel 2: mode-blocked MXU contraction (large channel counts).
#
#   a_ref : (TM, B, 2*Cin)          block of modes, [re | im] stacked
#   w_ref : (Mpad, 2*Cin, 2*Cout)   full stacked weight, resident in VMEM
#   o_ref : (TM, B, 2*Cout)
#
# One real batched matmul per block of modes replaces the 4 complex-part dots.
# ---------------------------------------------------------------------------
def _contract_mxu_kernel(a_ref, w_ref, o_ref, *, block_modes, weight_resident):
    a = a_ref[...]                                    # (TM, B, 2Cin)
    if weight_resident:
        m0 = pl.multiple_of(pl.program_id(0) * block_modes, block_modes)
        w = w_ref[pl.ds(m0, block_modes)]             # (TM, 2Cin, 2Cout)
    else:
        w = w_ref[...]
    o_ref[...] = jnp.einsum(
        "mbi,mio->mbo", a, w,
        preferred_element_type=jnp.float32).astype(o_ref.dtype)


def contract_modes_mxu(a, w, *, block_modes=None):
    """a: (M, B, 2Cin) f32,  w: (M, 2Cin, 2Cout) f32  ->  (M, B, 2Cout) f32."""
    M, B, ci2 = a.shape
    _, _, co2 = w.shape

    if block_modes is None:
        # ~2 MiB of activation+output per grid step (amortizes ~0.35 us/step).
        per_mode = 4 * (B * ci2 + B * co2)
        block_modes = max(1, min(M, (2 << 20) // max(per_mode, 1)))
    num_blocks = (M + block_modes - 1) // block_modes
    m_pad = num_blocks * block_modes
    if m_pad != M:                                    # keep in-kernel slices in bounds
        a = jnp.pad(a, ((0, m_pad - M), (0, 0), (0, 0)))
        w = jnp.pad(w, ((0, m_pad - M), (0, 0), (0, 0)))

    weight_resident = (m_pad * ci2 * co2 * 4) <= (16 << 20)
    if weight_resident:
        w_spec = pl.BlockSpec((m_pad, ci2, co2), lambda m: (0, 0, 0))
    else:
        w_spec = pl.BlockSpec((block_modes, ci2, co2), lambda m: (m, 0, 0))

    flops = 2 * m_pad * B * ci2 * co2
    bytes_accessed = 4 * (m_pad * B * ci2 + m_pad * ci2 * co2 + m_pad * B * co2)

    kernel = functools.partial(_contract_mxu_kernel,
                               block_modes=block_modes,
                               weight_resident=weight_resident)
    out = pl.pallas_call(
        kernel,
        out_shape=jax.ShapeDtypeStruct((m_pad, B, co2), jnp.float32),
        grid=(num_blocks,),
        in_specs=[
            pl.BlockSpec((block_modes, B, ci2), lambda m: (m, 0, 0)),
            w_spec,
        ],
        out_specs=pl.BlockSpec((block_modes, B, co2), lambda m: (m, 0, 0)),
        compiler_params=pltpu.CompilerParams(
            dimension_semantics=("parallel",),
            vmem_limit_bytes=_VMEM_LIMIT_BYTES,
        ),
        cost_estimate=pl.CostEstimate(
            flops=flops, transcendentals=0, bytes_accessed=bytes_accessed),
    )(a, w)
    return out[:M]


# ---------------------------------------------------------------------------
# Stacked real weight construction (done once; weights are tiny).
# ---------------------------------------------------------------------------
def _stack_weight_vpu(w):
    """w: (Cin, Cout, M) complex -> (2Cin, 2Cout, M) f32, [[wr, wi], [-wi, wr]]."""
    wr = jnp.real(w).astype(jnp.float32)
    wi = jnp.imag(w).astype(jnp.float32)
    top = jnp.concatenate([wr, wi], axis=1)
    bot = jnp.concatenate([-wi, wr], axis=1)
    return jnp.concatenate([top, bot], axis=0)


def _stack_weight_mxu(w):
    """w: (Cin, Cout, M) complex -> (M, 2Cin, 2Cout) f32, [[wr, wi], [-wi, wr]]."""
    wr = jnp.transpose(jnp.real(w), (2, 0, 1)).astype(jnp.float32)
    wi = jnp.transpose(jnp.imag(w), (2, 0, 1)).astype(jnp.float32)
    top = jnp.concatenate([wr, wi], axis=2)
    bot = jnp.concatenate([-wi, wr], axis=2)
    return jnp.concatenate([top, bot], axis=1)


class FactorizedSpectralConv1dPallas:
    """JAX/Pallas re-implementation of FactorizedSpectralConv1d (dense weight)."""

    # TODO(synk): the tltorch 'tucker' factorized weight is replaced by an
    # equivalent dense complex weight of the same reconstructed shape
    # (n_layers, Cin, Cout, modes); the factorization is a parameterization
    # detail, not part of the forward math.

    def __init__(self, in_channels, out_channels, modes, n_layers=1,
                 bias=True, scale="auto", fft_norm="forward", key=None):
        if n_layers > 1:
            assert in_channels == out_channels
        self.in_channels = in_channels
        self.out_channels = out_channels
        self.modes = modes
        self.n_layers = n_layers
        self.fft_norm = fft_norm
        if scale == "auto":
            scale = 1.0 / (in_channels * out_channels)

        if key is None:
            key = jax.random.PRNGKey(0)
        k_wr, k_wi, k_b = jax.random.split(key, 3)
        # Dense complex weight: (n_layers, Cin, Cout, modes)
        w_re = scale * jax.random.normal(
            k_wr, (n_layers, in_channels, out_channels, modes), jnp.float32)
        w_im = scale * jax.random.normal(
            k_wi, (n_layers, in_channels, out_channels, modes), jnp.float32)
        self.weight = w_re + 1j * w_im                        # complex64
        if bias:
            self.bias = scale * jax.random.normal(
                k_b, (1, out_channels, 1), jnp.float32)
        else:
            self.bias = jnp.zeros((1, out_channels, 1), jnp.float32)

        # Stacked real weights, built ONCE in the wrapper (tiny arrays).
        self._w_vpu = jnp.stack(
            [_stack_weight_vpu(self.weight[l]) for l in range(n_layers)])
        self._w_mxu = jnp.stack(
            [_stack_weight_mxu(self.weight[l]) for l in range(n_layers)])

    def __call__(self, x, indices=0, s=None, use_mxu=None):
        batchsize, channels, width = x.shape
        dtype = x.dtype
        if s is None:
            s = width
        M = self.modes
        cout = self.out_channels

        # FFT glue (no Pallas FFT primitive) -----------------------------
        x_ft = jnp.fft.rfft(x, norm=self.fft_norm)[:, :, :M]   # (B, Cin, M) c64

        if use_mxu is None:
            # MXU only pays off once the stacked dims roughly fill the MXU.
            use_mxu = (2 * self.in_channels >= 128) and (2 * self.out_channels >= 128)

        if use_mxu:
            # Mode-major stacked layout: one real matmul per block of modes.
            # TODO(synk): optionally cast a/w to bfloat16 on v6e/v7x when
            # MXU-bound (kept f32 here to stay bit-close to the reference).
            a_re = jnp.transpose(jnp.real(x_ft), (2, 0, 1))
            a_im = jnp.transpose(jnp.imag(x_ft), (2, 0, 1))
            a = jnp.concatenate([a_re, a_im], axis=2).astype(jnp.float32)  # (M,B,2Cin)
            o = contract_modes_mxu(a, self._w_mxu[indices])     # (M, B, 2Cout)
            out_modes = o[..., :cout] + 1j * o[..., cout:]      # (M, B, Cout)
            out_modes = jnp.transpose(out_modes, (1, 2, 0))     # (B, Cout, M)
        else:
            # Natural rfft layout, modes on lanes, no wrapper transposes.
            a = jnp.concatenate(
                [jnp.real(x_ft), jnp.imag(x_ft)], axis=1).astype(jnp.float32)  # (B,2Cin,M)
            o = contract_modes_vpu(a, self._w_vpu[indices])     # (B, 2Cout, M)
            out_modes = o[:, :cout, :] + 1j * o[:, cout:, :]    # (B, Cout, M)

        # Zero-pad up to full rfft length, inverse FFT, add bias ----------
        n_freq = width // 2 + 1
        out_fft = jnp.pad(out_modes, ((0, 0), (0, 0), (0, n_freq - M)))
        y = jnp.fft.irfft(out_fft, n=s, norm=self.fft_norm).astype(dtype)
        return y + self.bias.astype(dtype)


def _reference_forward(conv, x, indices=0, s=None):
    """Pure-JAX reference mirroring the PyTorch module."""
    B, C, W = x.shape
    if s is None:
        s = W
    x_ft = jnp.fft.rfft(x, norm=conv.fft_norm)
    w = conv.weight[indices]
    out_modes = jnp.einsum("bix,iox->box", x_ft[:, :, : conv.modes], w)
    n_freq = W // 2 + 1
    out_fft = jnp.pad(out_modes, ((0, 0), (0, 0), (0, n_freq - conv.modes)))
    y = jnp.fft.irfft(out_fft, n=s, norm=conv.fft_norm).astype(x.dtype)
    return y + conv.bias.astype(x.dtype)


if __name__ == "__main__":
    key = jax.random.PRNGKey(0)
    k_x, k_p = jax.random.split(key)

    batch, in_channels, out_channels, width, modes = 2, 4, 4, 16, 8
    x = jax.random.normal(k_x, (batch, in_channels, width), jnp.float32)

    conv = FactorizedSpectralConv1dPallas(
        in_channels, out_channels, modes, n_layers=1, bias=True, key=k_p)

    y_ref = jax.block_until_ready(_reference_forward(conv, x))

    # Default path for these small channel counts: lane-major VPU kernel.
    y_vpu = jax.block_until_ready(conv(x))
    assert y_vpu.shape == (batch, out_channels, width)
    assert jnp.allclose(y_vpu, y_ref, atol=1e-5, rtol=1e-5), "VPU path mismatch"

    # Also exercise the mode-blocked MXU kernel (forced) to validate it.
    y_mxu = jax.block_until_ready(conv(x, use_mxu=True))
    assert jnp.allclose(y_mxu, y_ref, atol=1e-5, rtol=1e-5), "MXU path mismatch"

    print("KERNEL_OK")
</pallas_src>

<mosaic_0001>
module attributes {stable_mosaic.version = 11 : i64} {
  func.func @_contract_vpu_kernel(%arg0: i32, %arg1: memref<2x8x8xf32, #tpu.memory_space<vmem>>, %arg2: memref<8x8x8xf32, #tpu.memory_space<vmem>>, %arg3: memref<2x8x8xf32, #tpu.memory_space<vmem>>) attributes {dimension_semantics = [#tpu.dimension_semantics<parallel>], iteration_bounds = array<i64: 1>, scalar_prefetch = 0 : i64, scratch_operands = 0 : i64, tpu.core_type = #tpu.core_type<tc>, window_params = [{transform_indices = @transform_0, window_bounds = array<i64: 2, 8, 8>}, {pipeline_mode = #tpu.pipeline_mode<synchronous>, transform_indices = @transform_1, window_bounds = array<i64: 8, 8, 8>}, {transform_indices = @transform_2, window_bounds = array<i64: 2, 8, 8>}]} {
    %c0 = arith.constant 0 : index
    %c0_0 = arith.constant 0 : index
    %c0_1 = arith.constant 0 : index
    %0 = vector.load %arg1[%c0, %c0_0, %c0_1] : memref<2x8x8xf32, #tpu.memory_space<vmem>>, vector<2x8x8xf32>
    %c0_2 = arith.constant 0 : index
    %c0_3 = arith.constant 0 : index
    %c0_4 = arith.constant 0 : index
    %1 = vector.load %arg2[%c0_2, %c0_3, %c0_4] : memref<8x8x8xf32, #tpu.memory_space<vmem>>, vector<8x8x8xf32>
    %2 = vector.extract_strided_slice %0 {offsets = [0, 0, 0], sizes = [2, 1, 8], strides = [1, 1, 1]} : vector<2x8x8xf32> to vector<2x1x8xf32>
    %3 = vector.extract_strided_slice %1 {offsets = [0, 0, 0], sizes = [1, 8, 8], strides = [1, 1, 1]} : vector<8x8x8xf32> to vector<1x8x8xf32>
    %4 = vector.broadcast %2 : vector<2x1x8xf32> to vector<2x8x8xf32>
    %5 = vector.broadcast %3 : vector<1x8x8xf32> to vector<2x8x8xf32>
    %6 = arith.mulf %4, %5 : vector<2x8x8xf32>
    %7 = vector.extract_strided_slice %0 {offsets = [0, 1, 0], sizes = [2, 1, 8], strides = [1, 1, 1]} : vector<2x8x8xf32> to vector<2x1x8xf32>
    %8 = vector.extract_strided_slice %1 {offsets = [1, 0, 0], sizes = [1, 8, 8], strides = [1, 1, 1]} : vector<8x8x8xf32> to vector<1x8x8xf32>
    %9 = vector.broadcast %7 : vector<2x1x8xf32> to vector<2x8x8xf32>
    %10 = vector.broadcast %8 : vector<1x8x8xf32> to vector<2x8x8xf32>
    %11 = arith.mulf %9, %10 : vector<2x8x8xf32>
    %12 = arith.addf %6, %11 : vector<2x8x8xf32>
    %13 = vector.extract_strided_slice %0 {offsets = [0, 2, 0], sizes = [2, 1, 8], strides = [1, 1, 1]} : vector<2x8x8xf32> to vector<2x1x8xf32>
    %14 = vector.extract_strided_slice %1 {offsets = [2, 0, 0], sizes = [1, 8, 8], strides = [1, 1, 1]} : vector<8x8x8xf32> to vector<1x8x8xf32>
    %15 = vector.broadcast %13 : vector<2x1x8xf32> to vector<2x8x8xf32>
    %16 = vector.broadcast %14 : vector<1x8x8xf32> to vector<2x8x8xf32>
    %17 = arith.mulf %15, %16 : vector<2x8x8xf32>
    %18 = arith.addf %12, %17 : vector<2x8x8xf32>
    %19 = vector.extract_strided_slice %0 {offsets = [0, 3, 0], sizes = [2, 1, 8], strides = [1, 1, 1]} : vector<2x8x8xf32> to vector<2x1x8xf32>
    %20 = vector.extract_strided_slice %1 {offsets = [3, 0, 0], sizes = [1, 8, 8], strides = [1, 1, 1]} : vector<8x8x8xf32> to vector<1x8x8xf32>
    %21 = vector.broadcast %19 : vector<2x1x8xf32> to vector<2x8x8xf32>
    %22 = vector.broadcast %20 : vector<1x8x8xf32> to vector<2x8x8xf32>
    %23 = arith.mulf %21, %22 : vector<2x8x8xf32>
    %24 = arith.addf %18, %23 : vector<2x8x8xf32>
    %25 = vector.extract_strided_slice %0 {offsets = [0, 4, 0], sizes = [2, 1, 8], strides = [1, 1, 1]} : vector<2x8x8xf32> to vector<2x1x8xf32>
    %26 = vector.extract_strided_slice %1 {offsets = [4, 0, 0], sizes = [1, 8, 8], strides = [1, 1, 1]} : vector<8x8x8xf32> to vector<1x8x8xf32>
    %27 = vector.broadcast %25 : vector<2x1x8xf32> to vector<2x8x8xf32>
    %28 = vector.broadcast %26 : vector<1x8x8xf32> to vector<2x8x8xf32>
    %29 = arith.mulf %27, %28 : vector<2x8x8xf32>
    %30 = arith.addf %24, %29 : vector<2x8x8xf32>
    %31 = vector.extract_strided_slice %0 {offsets = [0, 5, 0], sizes = [2, 1, 8], strides = [1, 1, 1]} : vector<2x8x8xf32> to vector<2x1x8xf32>
    %32 = vector.extract_strided_slice %1 {offsets = [5, 0, 0], sizes = [1, 8, 8], strides = [1, 1, 1]} : vector<8x8x8xf32> to vector<1x8x8xf32>
    %33 = vector.broadcast %31 : vector<2x1x8xf32> to vector<2x8x8xf32>
    %34 = vector.broadcast %32 : vector<1x8x8xf32> to vector<2x8x8xf32>
    %35 = arith.mulf %33, %34 : vector<2x8x8xf32>
    %36 = arith.addf %30, %35 : vector<2x8x8xf32>
    %37 = vector.extract_strided_slice %0 {offsets = [0, 6, 0], sizes = [2, 1, 8], strides = [1, 1, 1]} : vector<2x8x8xf32> to vector<2x1x8xf32>
    %38 = vector.extract_strided_slice %1 {offsets = [6, 0, 0], sizes = [1, 8, 8], strides = [1, 1, 1]} : vector<8x8x8xf32> to vector<1x8x8xf32>
    %39 = vector.broadcast %37 : vector<2x1x8xf32> to vector<2x8x8xf32>
    %40 = vector.broadcast %38 : vector<1x8x8xf32> to vector<2x8x8xf32>
    %41 = arith.mulf %39, %40 : vector<2x8x8xf32>
    %42 = arith.addf %36, %41 : vector<2x8x8xf32>
    %43 = vector.extract_strided_slice %0 {offsets = [0, 7, 0], sizes = [2, 1, 8], strides = [1, 1, 1]} : vector<2x8x8xf32> to vector<2x1x8xf32>
    %44 = vector.extract_strided_slice %1 {offsets = [7, 0, 0], sizes = [1, 8, 8], strides = [1, 1, 1]} : vector<8x8x8xf32> to vector<1x8x8xf32>
    %45 = vector.broadcast %43 : vector<2x1x8xf32> to vector<2x8x8xf32>
    %46 = vector.broadcast %44 : vector<1x8x8xf32> to vector<2x8x8xf32>
    %47 = arith.mulf %45, %46 : vector<2x8x8xf32>
    %48 = arith.addf %42, %47 : vector<2x8x8xf32>
    %c0_5 = arith.constant 0 : index
    %c0_6 = arith.constant 0 : index
    %c0_7 = arith.constant 0 : index
    %49 = vector.load %arg3[%c0_5, %c0_6, %c0_7] : memref<2x8x8xf32, #tpu.memory_space<vmem>>, vector<2x8x8xf32>
    tpu.vector_store %arg3[%c0_5, %c0_6, %c0_7], %48 {strides = array<i32>} : memref<2x8x8xf32, #tpu.memory_space<vmem>>, vector<2x8x8xf32>,
    return
  }
  func.func @transform_0(%arg0: i32) -> (i32, i32, i32) {
    %c0_i32 = arith.constant 0 : i32
    %c0_i32_0 = arith.constant 0 : i32
    %c0_i32_1 = arith.constant 0 : i32
    return %arg0, %c0_i32, %c0_i32_0 : i32, i32, i32
  }
  func.func @transform_1(%arg0: i32) -> (i32, i32, i32) {
    %c0_i32 = arith.constant 0 : i32
    %c0_i32_0 = arith.constant 0 : i32
    %c0_i32_1 = arith.constant 0 : i32
    %c0_i32_2 = arith.constant 0 : i32
    return %c0_i32, %c0_i32_0, %c0_i32_1 : i32, i32, i32
  }
  func.func @transform_2(%arg0: i32) -> (i32, i32, i32) {
    %c0_i32 = arith.constant 0 : i32
    %c0_i32_0 = arith.constant 0 : i32
    %c0_i32_1 = arith.constant 0 : i32
    return %arg0, %c0_i32, %c0_i32_0 : i32, i32, i32
  }
}

</mosaic_0001>

<bundles_post_ra>
// kernel: tpu_custom_call.1
= control target key start
LH: loop header
LB: loop body
LE: loop exit
PB: predicated region body
PF: predicated region fallthrough
CT: control target
= control target key end

     0   :  { %7 = vsyncpa [#allocation3], 0  ;;  %s274_s0 = inlined_call_operand.hbm [shape: f32[2,8,8], index: 0, kind: input, shape index: {}]   ;;  %s275_s1 = inlined_call_operand.hbm [shape: f32[8,8,8], index: 1, kind: input, shape index: {}]   ;;  %s276_s2 = inlined_call_operand.hbm [shape: f32[2,8,8], index: 2, kind: output, shape index: {}]  }
   0x1   :  { %8 = vsyncpa [#allocation6], 0 }
   0x2   :  { %9 = vsyncpa [#allocation4], 0  ;;  %s236_s9 = smov [#allocation2]  }
   0x3   :  { %s15_s10 = sshll.u32 %s236_s9, 4  ;;  %s16_s10 = int_to_ptr.vmem [resolvable:$true] %s15_s10 }
   0x4   :  { %s178_s11 = scalar_lea.vmem %s16_s10, 256  ;;  %p183_p1 = scmp.lt.s32.totalorder %s16_s10, %s16_s10 }
   0x5   :  { %p179_p0 = scmp.ne.s32.totalorder %s16_s10, %s178_s11  ;;  %p184_p2 = scmp.lt.s32.totalorder %s178_s11, %s178_s11 }
   0x7   :  { %p185_p3 = por %p184_p2, %p183_p1 }
   0x9   :  { %p186_p4 = pnand %p185_p3, %p179_p0 }
   0xb   :  { %189 = shalt.err (!%p186_p4)
}
   0xc   :  { %s237_s12 = smov 128   ;;  %s238_s13 = smov 8  }
   0xd   :  { %21 = dma.hbm_to_vmem [thread:$0]  %s274_s0, 256, %s16_s10, [#allocation3], %s237_s12, %s237_s12, %s238_s13  }
   0xe   :  { %s239_s16 = smov [#allocation5]  }
   0xf   :  { %s27_s17 = sshll.u32 %s239_s16, 4  ;;  %s28_s17 = int_to_ptr.vmem [resolvable:$true] %s27_s17 }
  0x10   :  { %s198_s18 = scalar_lea.vmem %s28_s17, 1024  ;;  %p203_p6 = scmp.lt.s32.totalorder %s28_s17, %s28_s17 }
  0x11   :  { %p199_p5 = scmp.ne.s32.totalorder %s28_s17, %s198_s18  ;;  %p204_p7 = scmp.lt.s32.totalorder %s198_s18, %s198_s18 }
  0x13   :  { %p205_p8 = por %p204_p7, %p203_p6 }
  0x15   :  { %p206_p9 = pnand %p205_p8, %p199_p5 }
  0x17   :  { %209 = shalt.err (!%p206_p9)
}
  0x18   :  { %33 = dma.hbm_to_vmem [thread:$0]  %s275_s1, 1024, %s28_s17, [#allocation6], %s237_s12, %s237_s12, %s238_s13  }
  0x19   :  { %230 = dma.done.wait [#allocation3], 256  }
  0x1a   :  { %231 = vsyncadd [#allocation3], 4294967040 }
  0x1b   :  { %232 = dma.done.wait [#allocation6], 1024  }
  0x1c   :  { %233 = vsyncadd [#allocation6], 4294966272  ;;  %v50_v0 = vlaneseq  ;;  %v40_v7 = vld [vmem:[#allocation2] sm:$0xff]  ;;  %v42_v8 = vld [vmem:[#allocation5] sm:$0xff]  ;;  %vm144_vm0 = vcmask 64512   ;;  %s240_s0 = smov [#allocation7]  }
  0x1d   :  { %v43_v9 = vld [vmem:[#allocation5 + $0x8] sm:$0xff]  ;;  %v44_v11 = vld [vmem:[#allocation5 + $0x10] sm:$0xff]  ;;  %v45_v12 = vld [vmem:[#allocation5 + $0x18] sm:$0xff]  ;;  %s152_s1 = sshll.u32 %s240_s0, 4  ;;  %s153_s1 = int_to_ptr.vmem [resolvable:$true] %s152_s1 }
  0x1e   :  { %v51_v1 = vshrl.u32 %v50_v0, 7  ;;  %v46_v19 = vld [vmem:[#allocation5 + $0x20] sm:$0xff]  ;;  %v41_v23 = vld [vmem:[#allocation2 + $0x8] sm:$0xff]  ;;  %v47_v27 = vld [vmem:[#allocation5 + $0x28] sm:$0xff]  ;;  %s210_s21 = scalar_lea.vmem %s153_s1, 256  ;;  %p215_p11 = scmp.lt.s32.totalorder %s153_s1, %s153_s1 }
  0x1f   :  { %v48_v36 = vld [vmem:[#allocation5 + $0x30] sm:$0xff]  ;;  %v49_v43 = vld [vmem:[#allocation5 + $0x38] sm:$0xff]  ;;  %p211_p10 = scmp.ne.s32.totalorder %s153_s1, %s210_s21  ;;  %p216_p12 = scmp.lt.s32.totalorder %s210_s21, %s210_s21 }
  0x20   :  { %v52_v2 = vsub.s32 0, %v51_v1  ;;  %v62_v3 = vsub.s32 1, %v51_v1  ;;  %v74_v4 = vsub.s32 2, %v51_v1  ;;  %v86_v5 = vsub.s32 3, %v51_v1 }
  0x21   :  { %v98_v6 = vsub.s32 4, %v51_v1  ;;  %v110_v10 = vsub.s32 5, %v51_v1  ;;  %v122_v18 = vsub.s32 6, %v51_v1  ;;  %v134_v26 = vsub.s32 7, %v51_v1  ;;  %p217_p13 = por %p216_p12, %p215_p11 }
  0x22   :  { %v53_v13 = vrot.slane %v40_v7, %v52_v2  ;;  %v63_v14 = vrot.slane %v40_v7, %v62_v3  ;;  %v75_v15 = vrot.slane %v40_v7, %v74_v4  ;;  %v87_v16 = vrot.slane %v40_v7, %v86_v5 }
  0x23   :  { %v99_v17 = vrot.slane %v40_v7, %v98_v6  ;;  %v111_v25 = vrot.slane %v40_v7, %v110_v10  ;;  %v57_v29 = vrot.slane %v41_v23, %v52_v2  ;;  %v67_v30 = vrot.slane %v41_v23, %v62_v3  ;;  %p218_p0 = pnand %p217_p13, %p211_p10 }
  0x24   :  { %v58_v20 = vmul.f32 %v53_v13, %v42_v8  ;;  %v68_v21 = vmul.f32 %v63_v14, %v43_v9  ;;  %v80_v22 = vmul.f32 %v75_v15, %v44_v11  ;;  %v92_v24 = vmul.f32 %v87_v16, %v45_v12 }
  0x25   :  { %v79_v31 = vrot.slane %v41_v23, %v74_v4  ;;  %v104_v32 = vmul.f32 %v99_v17, %v46_v19  ;;  %v123_v33 = vrot.slane %v40_v7, %v122_v18  ;;  %v91_v34 = vrot.slane %v41_v23, %v86_v5 }
  0x26   :  { %v70_v28 = vadd.f32 %v68_v21, %v58_v20  ;;  %v103_v35 = vrot.slane %v41_v23, %v98_v6  ;;  %v59_v38 = vmul.f32 %v57_v29, %v42_v8  ;;  %v69_v39 = vmul.f32 %v67_v30, %v43_v9 }
  0x27   :  { %v81_v40 = vmul.f32 %v79_v31, %v44_v11  ;;  %v116_v41 = vmul.f32 %v111_v25, %v47_v27  ;;  %v135_v42 = vrot.slane %v40_v7, %v134_v26  ;;  %v93_v46 = vmul.f32 %v91_v34, %v45_v12 }
  0x28   :  { %v82_v37 = vadd.f32 %v80_v22, %v70_v28  ;;  %v71_v45 = vadd.f32 %v69_v39, %v59_v38  ;;  %v115_v47 = vrot.slane %v41_v23, %v110_v10  ;;  %v128_v48 = vmul.f32 %v123_v33, %v48_v36 }
  0x29   :  { %v105_v51 = vmul.f32 %v103_v35, %v46_v19  ;;  %v127_v52 = vrot.slane %v41_v23, %v122_v18  ;;  %v140_v53 = vmul.f32 %v135_v42, %v49_v43  ;;  %v139_v57 = vrot.slane %v41_v23, %v134_v26 }
  0x2a   :  { %v94_v44 = vadd.f32 %v92_v24, %v82_v37  ;;  %v83_v50 = vadd.f32 %v81_v40, %v71_v45  ;;  %v117_v56 = vmul.f32 %v115_v47, %v47_v27 }
  0x2b   :  { %v129_v60 = vmul.f32 %v127_v52, %v48_v36  ;;  %v141_v63 = vmul.f32 %v139_v57, %v49_v43 }
  0x2c   :  { %v106_v49 = vadd.f32 %v104_v32, %v94_v44  ;;  %v95_v55 = vadd.f32 %v93_v46, %v83_v50 }
  0x2e   :  { %v118_v54 = vadd.f32 %v116_v41, %v106_v49  ;;  %v107_v59 = vadd.f32 %v105_v51, %v95_v55 }
  0x30   :  { %v130_v58 = vadd.f32 %v128_v48, %v118_v54  ;;  %v119_v62 = vadd.f32 %v117_v56, %v107_v59 }
  0x32   :  { %v142_v61 = vadd.f32 %v140_v53, %v130_v58  ;;  %v131_v0 = vadd.f32 %v129_v60, %v119_v62 }
  0x34   :  { %145 = vst.msk [vmem:[#allocation7] sm:$0xff] %vm144_vm0, %v142_v61  ;;  %v143_v1 = vadd.f32 %v141_v63, %v131_v0 }
  0x36   :  { %146 = vst.msk [vmem:[#allocation7 + $0x8] sm:$0xff] %vm144_vm0, %v143_v1 }
  0x37   :  { %221 = shalt.err (!%p218_p0)
}
  0x38   :  { %158 = dma.vmem_to_hbm [thread:$0]  %s153_s1, 256, %s276_s2, [#allocation4], %s237_s12, %s237_s12, %s238_s13  }
  0x39   :  { %234 = dma.done.wait [#allocation4], 256  }
  0x3a   :  { %235 = vsyncadd [#allocation4], 4294967040 }
  0x3b   :  { %162 = vsyncpa [#allocation3], 1 }
  0x3c   :  { %163 = vsyncpa [#allocation6], 1 }
  0x3d   :  { %164 = vsyncpa [#allocation4], 1 }

</bundles_post_ra>
